<compile_context>
chip_gen: v5e
topology: v5e:2x2
jax: 0.10.0
libtpu: 0.0.40
codegen_flags: <defaults>
</compile_context>

<pallas_src>
import math
from functools import partial

import jax
import jax.numpy as jnp
from jax.experimental import pallas as pl
from jax.experimental.pallas import tpu as pltpu


def _round_up(x, m):
    return ((x + m - 1) // m) * m


# ----------------------------------------------------------------------------
# Kernel 1: tiled fused linear  y = x @ W + b
#   grid = (M/tm, N/tn, K/tk), f32 accumulator scratch, K axis is the reduction.
# ----------------------------------------------------------------------------
def _linear_bias_kernel(x_ref, w_ref, b_ref, o_ref, acc_ref):
    k = pl.program_id(2)

    @pl.when(k == 0)
    def _():
        acc_ref[...] = jnp.zeros(acc_ref.shape, acc_ref.dtype)

    acc_ref[...] += jnp.dot(x_ref[...], w_ref[...],
                            preferred_element_type=jnp.float32)

    @pl.when(k == pl.num_programs(2) - 1)
    def _():
        o_ref[...] = (acc_ref[...] + b_ref[...]).astype(o_ref.dtype)


def pallas_linear(x2d, w, b, *, out_dtype=None, tm=512, tn=512, tk=512):
    """x2d: (M, K), w: (K, N), b: (N,) f32  ->  (M, N) in out_dtype.

    512 tiles (double-buffered) use ~7 MiB f32 / ~4 MiB bf16 of VMEM; we raise
    vmem_limit_bytes explicitly so the scoped default never caps the tile choice.
    Inputs are zero-padded up to tile multiples and the result is sliced back.
    """
    M, K = x2d.shape
    Kw, N = w.shape
    assert Kw == K
    out_dtype = x2d.dtype if out_dtype is None else out_dtype

    row_align = 16 if x2d.dtype == jnp.bfloat16 else 8   # bf16 packs 16 rows / vreg
    tm = min(tm, _round_up(M, row_align))
    tk = min(tk, _round_up(K, 128))
    tn = min(tn, _round_up(N, 128))
    Mp, Kp, Np = _round_up(M, tm), _round_up(K, tk), _round_up(N, tn)

    if (Mp, Kp) != (M, K):
        x2d = jnp.pad(x2d, ((0, Mp - M), (0, Kp - K)))
    if (Kp, Np) != (K, N):
        w = jnp.pad(w, ((0, Kp - K), (0, Np - N)))
    if Np != N:
        b = jnp.pad(b, (0, Np - N))
    b2d = b.reshape(1, Np).astype(jnp.float32)

    in_itemsize = jnp.dtype(x2d.dtype).itemsize
    cost = pl.CostEstimate(
        flops=2 * Mp * Np * Kp,
        transcendentals=0,
        bytes_accessed=in_itemsize * (Mp * Kp * (Np // tn) + Kp * Np * (Mp // tm))
        + 4 * Np + jnp.dtype(out_dtype).itemsize * Mp * Np,
    )

    out = pl.pallas_call(
        _linear_bias_kernel,
        out_shape=jax.ShapeDtypeStruct((Mp, Np), out_dtype),
        grid_spec=pltpu.PrefetchScalarGridSpec(
            num_scalar_prefetch=0,
            grid=(Mp // tm, Np // tn, Kp // tk),
            in_specs=[
                pl.BlockSpec((tm, tk), lambda i, j, k: (i, k)),
                pl.BlockSpec((tk, tn), lambda i, j, k: (k, j)),
                pl.BlockSpec((1, tn), lambda i, j, k: (0, j)),
            ],
            out_specs=pl.BlockSpec((tm, tn), lambda i, j, k: (i, j)),
            scratch_shapes=[pltpu.VMEM((tm, tn), jnp.float32)],
        ),
        compiler_params=pltpu.CompilerParams(
            dimension_semantics=("parallel", "parallel", "arbitrary"),
            vmem_limit_bytes=64 * 1024 * 1024),
        cost_estimate=cost,
    )(x2d, w, b2d)

    if (Mp, Np) != (M, N):
        out = out[:M, :N]
    return out


# ----------------------------------------------------------------------------
# Kernel 2: multi-head flash attention, heads folded into the lane axis.
#   qkv3: (B, Lp, 3*Cp) where slab 0/1/2 of the last axis holds q/k/v and head h
#   of each slab lives at lanes [h*Dh, (h+1)*Dh).  Grid = (B, Lq_blocks, Lkv_blocks),
#   KV axis last and "arbitrary"; online-softmax state in VMEM scratch.
#   All scratch updates are single full-width lane-dense stores per KV step.
# ----------------------------------------------------------------------------
def _flash_mha_kernel(q_ref, k_ref, v_ref, o_ref, m_ref, l_ref, acc_ref, *,
                      num_heads, head_dim, block_kv, seq_len, mask_kv,
                      lanes_pad, approx_recip):
    ki = pl.program_id(2)

    @pl.when(ki == 0)
    def _():
        m_ref[...] = jnp.full(m_ref.shape, -jnp.inf, dtype=m_ref.dtype)
        l_ref[...] = jnp.zeros(l_ref.shape, l_ref.dtype)
        acc_ref[...] = jnp.zeros(acc_ref.shape, acc_ref.dtype)

    q = q_ref[0]          # (tq,  Cp)  compute dtype
    k = k_ref[0]          # (tkv, Cp)
    v = v_ref[0]          # (tkv, Cp)
    tq = q.shape[0]

    if mask_kv:  # additive bias built ONCE per KV step, shared by all heads
        col = (jax.lax.broadcasted_iota(jnp.int32, (tq, k.shape[0]), 1)
               + ki * block_kv)
        pad_bias = jnp.where(col < seq_len, 0.0, -1e30).astype(jnp.float32)

    # m / l are stored lane-broadcast across each head's Dh lanes -> full-width stores.
    m_prev = m_ref[...]   # (tq, Cp)
    l_prev = l_ref[...]

    m_cols, l_cols, alpha_cols, pv_cols = [], [], [], []
    for h in range(num_heads):                      # static unroll over heads
        sl = slice(h * head_dim, (h + 1) * head_dim)
        q_h, k_h, v_h = q[:, sl], k[:, sl], v[:, sl]

        # scores; softmax scale is pre-folded into the q projection weights/bias.
        s = jax.lax.dot_general(q_h, k_h, (((1,), (1,)), ((), ())),
                                preferred_element_type=jnp.float32)    # (tq, tkv)
        if mask_kv:
            s = s + pad_bias

        m_p = m_prev[:, h * head_dim:h * head_dim + 1]                 # (tq, 1)
        l_p = l_prev[:, h * head_dim:h * head_dim + 1]
        m_n = jnp.maximum(m_p, jnp.max(s, axis=-1, keepdims=True))
        alpha = jnp.exp(m_p - m_n)                                     # (tq, 1)
        p = jnp.exp(s - m_n)                                           # unnormalized
        l_n = alpha * l_p + jnp.sum(p, axis=-1, keepdims=True)

        pv = jnp.dot(p.astype(v_h.dtype), v_h,
                     preferred_element_type=jnp.float32)               # (tq, Dh)

        m_cols.append(jnp.broadcast_to(m_n, (tq, head_dim)))
        l_cols.append(jnp.broadcast_to(l_n, (tq, head_dim)))
        alpha_cols.append(jnp.broadcast_to(alpha, (tq, head_dim)))
        pv_cols.append(pv)

    if lanes_pad:   # padded lanes: acc stays 0, l stays 1 (safe full-width reciprocal)
        zeros_pad = jnp.zeros((tq, lanes_pad), jnp.float32)
        ones_pad = jnp.ones((tq, lanes_pad), jnp.float32)
        m_cols.append(zeros_pad)
        l_cols.append(ones_pad)
        alpha_cols.append(ones_pad)
        pv_cols.append(zeros_pad)

    # One full-width lane-dense update per scratch per KV step.
    m_ref[...] = jnp.concatenate(m_cols, axis=1)
    l_ref[...] = jnp.concatenate(l_cols, axis=1)
    acc_ref[...] = (acc_ref[...] * jnp.concatenate(alpha_cols, axis=1)
                    + jnp.concatenate(pv_cols, axis=1))

    @pl.when(ki == pl.num_programs(2) - 1)
    def _():
        # normalize AFTER P@V; l is already lane-broadcast so this is fully lane-dense.
        inv = pl.reciprocal(l_ref[...], approx=approx_recip)           # (tq, Cp)
        o_ref[0] = (acc_ref[...] * inv).astype(o_ref.dtype)            # unmasked store


def pallas_flash_attention(qkv3, *, num_heads, head_dim, block_q=512, block_kv=256):
    """qkv3: (B, L, 3*Cp) -> (B, L, Cp) attention output (heads on the lane axis)."""
    B, L, three_cp = qkv3.shape
    Cp = three_cp // 3
    C = num_heads * head_dim
    lanes_pad = Cp - C

    is_bf16 = qkv3.dtype == jnp.bfloat16
    align = 16 if is_bf16 else 8
    La = _round_up(L, align)
    tkv = min(block_kv, La)
    tq = min(block_q, La)
    if tq % tkv:          # keep tq a multiple of tkv so one Lp works for both axes
        tq = tkv
    Lp = _round_up(L, tq)

    x = qkv3 if Lp == L else jnp.pad(qkv3, ((0, 0), (0, Lp - L), (0, 0)))
    nq, nkv = Lp // tq, Lp // tkv

    itemsize = jnp.dtype(qkv3.dtype).itemsize
    cost = pl.CostEstimate(
        flops=4 * B * num_heads * Lp * Lp * head_dim,
        transcendentals=B * num_heads * Lp * Lp,
        bytes_accessed=itemsize * B * Lp * Cp * (2 + 2 * nq),
    )

    kern = partial(_flash_mha_kernel, num_heads=num_heads, head_dim=head_dim,
                   block_kv=tkv, seq_len=L, mask_kv=(Lp > L),
                   lanes_pad=lanes_pad, approx_recip=is_bf16)

    out = pl.pallas_call(
        kern,
        out_shape=jax.ShapeDtypeStruct((B, Lp, Cp), qkv3.dtype),
        grid_spec=pltpu.PrefetchScalarGridSpec(
            num_scalar_prefetch=0,
            grid=(B, nq, nkv),
            in_specs=[
                # read q/k/v slabs directly out of the projection output: the block
                # index on the last axis selects slab 0 (q), 1 (k) or 2 (v).
                # TODO(synk): add pipeline_mode=pl.Buffered(3) on k/v if profiling
                # shows exposed DMA after the lane-dense rework (v7x especially).
                pl.BlockSpec((1, tq, Cp), lambda b, qi, ki: (b, qi, 0)),
                pl.BlockSpec((1, tkv, Cp), lambda b, qi, ki: (b, ki, 1)),
                pl.BlockSpec((1, tkv, Cp), lambda b, qi, ki: (b, ki, 2)),
            ],
            out_specs=pl.BlockSpec((1, tq, Cp), lambda b, qi, ki: (b, qi, 0)),
            scratch_shapes=[
                pltpu.VMEM((tq, Cp), jnp.float32),   # running max  m (lane-broadcast)
                pltpu.VMEM((tq, Cp), jnp.float32),   # running sum  l (lane-broadcast)
                pltpu.VMEM((tq, Cp), jnp.float32),   # running output acc
            ],
        ),
        compiler_params=pltpu.CompilerParams(
            # B and q-block axes shard across megacore TCs on v7x (B*nq >= 2 here).
            dimension_semantics=("parallel", "parallel", "arbitrary"),
            vmem_limit_bytes=64 * 1024 * 1024),
        cost_estimate=cost,
    )(x, x, x)

    if Lp > L:
        out = out[:, :L, :]
    return out


# ----------------------------------------------------------------------------
# One-time parameter re-layout (module init): split/transpose/pad qkv weight,
# fold the softmax scale into the q projection, build the concat bias, pad w_proj.
# ----------------------------------------------------------------------------
def prepare_self_attention_params(params, num_heads, compute_dtype=jnp.float32):
    w_qkv = params["w_qkv"]                              # (3C, C) torch (out, in)
    C = w_qkv.shape[1]
    head_dim = C // num_heads
    scale = 1.0 / math.sqrt(head_dim)
    Cp = _round_up(C, 128)

    w_q, w_k, w_v = w_qkv[:C], w_qkv[C:2 * C], w_qkv[2 * C:]

    def _pad_cols(wT):                                   # (C, C) -> (C, Cp)
        return jnp.pad(wT, ((0, 0), (0, Cp - C))) if Cp > C else wT

    def _pad_vec(b):
        return jnp.pad(b, (0, Cp - C)) if Cp > C else b

    # Fold the softmax scale into w_q / q_bias -> no per-score multiply in the kernel.
    w_qkv_p = jnp.concatenate(
        [_pad_cols(w_q.T) * scale, _pad_cols(w_k.T), _pad_cols(w_v.T)], axis=1)  # (C, 3Cp)
    qkv_bias = jnp.concatenate(
        [_pad_vec(params["q_bias"]) * scale,
         jnp.zeros((Cp,), jnp.float32),
         _pad_vec(params["v_bias"])], axis=0)                                    # (3Cp,)

    w_proj_p = params["w_proj"].T                                                # (C, C)
    if Cp > C:  # zero rows absorb the (zero) padded lanes of the attention output
        w_proj_p = jnp.pad(w_proj_p, ((0, Cp - C), (0, 0)))                      # (Cp, C)

    return {
        "w_qkv_p": w_qkv_p.astype(compute_dtype),
        "qkv_bias": qkv_bias.astype(jnp.float32),
        "w_proj_p": w_proj_p.astype(compute_dtype),
        "b_proj": params["b_proj"].astype(jnp.float32),
    }


# ----------------------------------------------------------------------------
# SelfAttention forward (dropout = 0, attn_l2_norm = False, no attn_bias)
# ----------------------------------------------------------------------------
def self_attention_forward(x, prepped, *, num_heads):
    """x: (B, L, C) f32, prepped: output of prepare_self_attention_params.

    Compute dtype follows the prepped weights (f32 or bf16 MXU operands on any
    generation); accumulation and softmax math stay f32 inside the kernels.
    """
    B, L, C = x.shape
    head_dim = C // num_heads
    cdt = prepped["w_qkv_p"].dtype
    Cp = prepped["w_proj_p"].shape[0]

    # ---- QKV projection (tiled Pallas matmul) ----
    x2d = x.reshape(B * L, C).astype(cdt)
    qkv = pallas_linear(x2d, prepped["w_qkv_p"], prepped["qkv_bias"],
                        out_dtype=cdt)                                   # (B*L, 3Cp)
    qkv = qkv.reshape(B, L, 3 * Cp)

    # ---- fused multi-head flash attention (no HBM transposes / slicing) ----
    o = pallas_flash_attention(qkv, num_heads=num_heads, head_dim=head_dim)  # (B, L, Cp)
    o2d = o.reshape(B * L, Cp)

    # ---- output projection ----
    out = pallas_linear(o2d, prepped["w_proj_p"], prepped["b_proj"],
                        out_dtype=jnp.float32)                           # (B*L, C)
    return out.reshape(B, L, C)


# ----------------------------------------------------------------------------
# Pure-JAX reference (for correctness check)
# ----------------------------------------------------------------------------
def self_attention_reference(x, params, num_heads):
    B, L, C = x.shape
    head_dim = C // num_heads
    scale = 1.0 / math.sqrt(head_dim)
    qkv_bias = jnp.concatenate(
        [params["q_bias"], jnp.zeros((C,), jnp.float32), params["v_bias"]], axis=0
    )
    qkv = x.reshape(B * L, C) @ params["w_qkv"].T + qkv_bias
    qkv = qkv.reshape(B, L, 3, num_heads, head_dim)
    q, k, v = qkv[:, :, 0], qkv[:, :, 1], qkv[:, :, 2]
    q = jnp.transpose(q, (0, 2, 1, 3))
    k = jnp.transpose(k, (0, 2, 1, 3))
    v = jnp.transpose(v, (0, 2, 1, 3))
    s = jnp.einsum("bhqd,bhkd->bhqk", q, k) * scale
    p = jax.nn.softmax(s, axis=-1)
    o = jnp.einsum("bhqk,bhkd->bhqd", p, v)
    o = jnp.transpose(o, (0, 2, 1, 3)).reshape(B * L, C)
    out = o @ params["w_proj"].T + params["b_proj"]
    return out.reshape(B, L, C)


if __name__ == "__main__":
    # Small shapes consistent with the module: B=2, L=8, C=32, num_heads=4 (head_dim=8)
    B, L, C, H = 2, 8, 32, 4

    key = jax.random.PRNGKey(0)
    k_x, k_wqkv, k_qb, k_vb, k_wp, k_bp = jax.random.split(key, 6)

    x = jax.random.normal(k_x, (B, L, C), dtype=jnp.float32)

    params = {
        # mat_qkv: nn.Linear(C, 3C, bias=False) -> weight (3C, C)
        "w_qkv": jax.random.normal(k_wqkv, (3 * C, C), dtype=jnp.float32) * 0.05,
        # q_bias / v_bias are zero-initialized params in the module; small random values
        # exercise the concat(q_bias, zeros, v_bias) path.
        "q_bias": jax.random.normal(k_qb, (C,), dtype=jnp.float32) * 0.05,
        "v_bias": jax.random.normal(k_vb, (C,), dtype=jnp.float32) * 0.05,
        # proj: nn.Linear(C, C) -> weight (C, C), bias (C,)
        "w_proj": jax.random.normal(k_wp, (C, C), dtype=jnp.float32) * 0.05,
        "b_proj": jax.random.normal(k_bp, (C,), dtype=jnp.float32) * 0.05,
    }

    ref = self_attention_reference(x, params, num_heads=H)

    fwd = jax.jit(partial(self_attention_forward, num_heads=H))

    # f32 path: reference fidelity (exact final reciprocal).
    prepped_f32 = prepare_self_attention_params(params, num_heads=H,
                                                compute_dtype=jnp.float32)
    out = jax.block_until_ready(fwd(x, prepped_f32))
    assert out.shape == (B, L, C)
    assert jnp.allclose(out, ref, atol=5e-3, rtol=5e-3), \
        "Pallas f32 output mismatch vs reference"

    # bf16 MXU-operand path (all generations); f32 accumulation/softmax inside.
    # Also exercises the 16-aligned / masked-KV padding path (L=8 -> Lp=16).
    prepped_bf16 = prepare_self_attention_params(params, num_heads=H,
                                                 compute_dtype=jnp.bfloat16)
    out_bf16 = jax.block_until_ready(fwd(x, prepped_bf16))
    assert jnp.allclose(out_bf16.astype(jnp.float32), ref, atol=5e-2, rtol=5e-2), \
        "Pallas bf16 output mismatch vs reference"

    print("KERNEL_OK")
</pallas_src>

<mosaic_0001>
module attributes {stable_mosaic.version = 11 : i64} {
  func.func @_flash_mha_kernel(%arg0: i32, %arg1: i32, %arg2: i32, %arg3: memref<1x8x128xf32, #tpu.memory_space<vmem>>, %arg4: memref<1x8x128xf32, #tpu.memory_space<vmem>>, %arg5: memref<1x8x128xf32, #tpu.memory_space<vmem>>, %arg6: memref<1x8x128xf32, #tpu.memory_space<vmem>>, %arg7: memref<8x128xf32, #tpu.memory_space<vmem>>, %arg8: memref<8x128xf32, #tpu.memory_space<vmem>>, %arg9: memref<8x128xf32, #tpu.memory_space<vmem>>) attributes {dimension_semantics = [#tpu.dimension_semantics<parallel>, #tpu.dimension_semantics<parallel>, #tpu.dimension_semantics<arbitrary>], iteration_bounds = array<i64: 2, 1, 1>, scalar_prefetch = 0 : i64, scratch_operands = 3 : i64, tpu.core_type = #tpu.core_type<tc>, window_params = [{transform_indices = @transform_0, window_bounds = array<i64: 1, 8, 128>}, {transform_indices = @transform_1, window_bounds = array<i64: 1, 8, 128>}, {transform_indices = @transform_2, window_bounds = array<i64: 1, 8, 128>}, {transform_indices = @transform_3, window_bounds = array<i64: 1, 8, 128>}]} {
    %c0_i32 = arith.constant 0 : i32
    %0 = arith.cmpi eq, %arg2, %c0_i32 : i32
    %1 = arith.extui %0 : i1 to i32
    %c0_i32_0 = arith.constant 0 : i32
    %2 = arith.cmpi ne, %1, %c0_i32_0 : i32
    scf.if %2 {
      %cst_40 = arith.constant 0xFF800000 : f32
      %126 = vector.broadcast %cst_40 : f32 to vector<8x128xf32>
      %c0_41 = arith.constant 0 : index
      %c0_42 = arith.constant 0 : index
      %127 = vector.load %arg7[%c0_41, %c0_42] : memref<8x128xf32, #tpu.memory_space<vmem>>, vector<8x128xf32>
      tpu.vector_store %arg7[%c0_41, %c0_42], %126 {strides = array<i32>} : memref<8x128xf32, #tpu.memory_space<vmem>>, vector<8x128xf32>,
      %cst_43 = arith.constant 0.000000e+00 : f32
      %128 = vector.broadcast %cst_43 : f32 to vector<8x128xf32>
      %c0_44 = arith.constant 0 : index
      %c0_45 = arith.constant 0 : index
      %129 = vector.load %arg8[%c0_44, %c0_45] : memref<8x128xf32, #tpu.memory_space<vmem>>, vector<8x128xf32>
      tpu.vector_store %arg8[%c0_44, %c0_45], %128 {strides = array<i32>} : memref<8x128xf32, #tpu.memory_space<vmem>>, vector<8x128xf32>,
      %cst_46 = arith.constant 0.000000e+00 : f32
      %130 = vector.broadcast %cst_46 : f32 to vector<8x128xf32>
      %c0_47 = arith.constant 0 : index
      %c0_48 = arith.constant 0 : index
      %131 = vector.load %arg9[%c0_47, %c0_48] : memref<8x128xf32, #tpu.memory_space<vmem>>, vector<8x128xf32>
      tpu.vector_store %arg9[%c0_47, %c0_48], %130 {strides = array<i32>} : memref<8x128xf32, #tpu.memory_space<vmem>>, vector<8x128xf32>,
    } else {
    }
    %c0 = arith.constant 0 : index
    %c0_1 = arith.constant 0 : index
    %c0_2 = arith.constant 0 : index
    %3 = vector.load %arg3[%c0, %c0_1, %c0_2] : memref<1x8x128xf32, #tpu.memory_space<vmem>>, vector<1x8x128xf32>
    %4 = vector.shape_cast %3 : vector<1x8x128xf32> to vector<8x128xf32>
    %c0_3 = arith.constant 0 : index
    %c0_4 = arith.constant 0 : index
    %c0_5 = arith.constant 0 : index
    %5 = vector.load %arg4[%c0_3, %c0_4, %c0_5] : memref<1x8x128xf32, #tpu.memory_space<vmem>>, vector<1x8x128xf32>
    %6 = vector.shape_cast %5 : vector<1x8x128xf32> to vector<8x128xf32>
    %c0_6 = arith.constant 0 : index
    %c0_7 = arith.constant 0 : index
    %c0_8 = arith.constant 0 : index
    %7 = vector.load %arg5[%c0_6, %c0_7, %c0_8] : memref<1x8x128xf32, #tpu.memory_space<vmem>>, vector<1x8x128xf32>
    %8 = vector.shape_cast %7 : vector<1x8x128xf32> to vector<8x128xf32>
    %c0_9 = arith.constant 0 : index
    %c0_10 = arith.constant 0 : index
    %9 = vector.load %arg7[%c0_9, %c0_10] : memref<8x128xf32, #tpu.memory_space<vmem>>, vector<8x128xf32>
    %c0_11 = arith.constant 0 : index
    %c0_12 = arith.constant 0 : index
    %10 = vector.load %arg8[%c0_11, %c0_12] : memref<8x128xf32, #tpu.memory_space<vmem>>, vector<8x128xf32>
    %11 = vector.extract_strided_slice %4 {offsets = [0, 0], sizes = [8, 8], strides = [1, 1]} : vector<8x128xf32> to vector<8x8xf32>
    %12 = vector.extract_strided_slice %6 {offsets = [0, 0], sizes = [8, 8], strides = [1, 1]} : vector<8x128xf32> to vector<8x8xf32>
    %13 = vector.extract_strided_slice %8 {offsets = [0, 0], sizes = [8, 8], strides = [1, 1]} : vector<8x128xf32> to vector<8x8xf32>
    %cst = arith.constant dense<0.000000e+00> : vector<8x8xf32>
    %14 = tpu.matmul %11, %12, %cst {dimension_numbers = #tpu.dot_dimension_numbers<[1], [1], [0], [0], [0, 0, 1, 0], [], []>} : vector<8x8xf32>, vector<8x8xf32>, vector<8x8xf32> -> vector<8x8xf32>
    %15 = vector.extract_strided_slice %9 {offsets = [0, 0], sizes = [8, 1], strides = [1, 1]} : vector<8x128xf32> to vector<8x1xf32>
    %16 = vector.extract_strided_slice %10 {offsets = [0, 0], sizes = [8, 1], strides = [1, 1]} : vector<8x128xf32> to vector<8x1xf32>
    %cst_13 = arith.constant dense<0xFF800000> : vector<8xf32>
    %17 = vector.multi_reduction <maximumf>, %14, %cst_13 [1] : vector<8x8xf32> to vector<8xf32>
    %18 = vector.shape_cast %17 : vector<8xf32> to vector<8x1xf32>
    %19 = arith.maximumf %15, %18 : vector<8x1xf32>
    %20 = arith.subf %15, %19 : vector<8x1xf32>
    %21 = math.exp %20 : vector<8x1xf32>
    %22 = vector.broadcast %19 : vector<8x1xf32> to vector<8x8xf32>
    %23 = arith.subf %14, %22 : vector<8x8xf32>
    %24 = math.exp %23 : vector<8x8xf32>
    %25 = arith.mulf %21, %16 : vector<8x1xf32>
    %cst_14 = arith.constant dense<0.000000e+00> : vector<8xf32>
    %26 = vector.multi_reduction <add>, %24, %cst_14 [1] : vector<8x8xf32> to vector<8xf32>
    %27 = vector.shape_cast %26 : vector<8xf32> to vector<8x1xf32>
    %28 = arith.addf %25, %27 : vector<8x1xf32>
    %cst_15 = arith.constant dense<0.000000e+00> : vector<8x8xf32>
    %29 = tpu.matmul %24, %13, %cst_15 {dimension_numbers = #tpu.dot_dimension_numbers<[1], [0], [0], [1], [0, 0, 1, 1], [], []>} : vector<8x8xf32>, vector<8x8xf32>, vector<8x8xf32> -> vector<8x8xf32>
    %30 = vector.shape_cast %19 : vector<8x1xf32> to vector<8x1xf32>
    %31 = vector.broadcast %30 : vector<8x1xf32> to vector<8x8xf32>
    %32 = vector.shape_cast %28 : vector<8x1xf32> to vector<8x1xf32>
    %33 = vector.broadcast %32 : vector<8x1xf32> to vector<8x8xf32>
    %34 = vector.shape_cast %21 : vector<8x1xf32> to vector<8x1xf32>
    %35 = vector.broadcast %34 : vector<8x1xf32> to vector<8x8xf32>
    %36 = vector.extract_strided_slice %4 {offsets = [0, 8], sizes = [8, 8], strides = [1, 1]} : vector<8x128xf32> to vector<8x8xf32>
    %37 = vector.extract_strided_slice %6 {offsets = [0, 8], sizes = [8, 8], strides = [1, 1]} : vector<8x128xf32> to vector<8x8xf32>
    %38 = vector.extract_strided_slice %8 {offsets = [0, 8], sizes = [8, 8], strides = [1, 1]} : vector<8x128xf32> to vector<8x8xf32>
    %cst_16 = arith.constant dense<0.000000e+00> : vector<8x8xf32>
    %39 = tpu.matmul %36, %37, %cst_16 {dimension_numbers = #tpu.dot_dimension_numbers<[1], [1], [0], [0], [0, 0, 1, 0], [], []>} : vector<8x8xf32>, vector<8x8xf32>, vector<8x8xf32> -> vector<8x8xf32>
    %40 = vector.extract_strided_slice %9 {offsets = [0, 8], sizes = [8, 1], strides = [1, 1]} : vector<8x128xf32> to vector<8x1xf32>
    %41 = vector.extract_strided_slice %10 {offsets = [0, 8], sizes = [8, 1], strides = [1, 1]} : vector<8x128xf32> to vector<8x1xf32>
    %cst_17 = arith.constant dense<0xFF800000> : vector<8xf32>
    %42 = vector.multi_reduction <maximumf>, %39, %cst_17 [1] : vector<8x8xf32> to vector<8xf32>
    %43 = vector.shape_cast %42 : vector<8xf32> to vector<8x1xf32>
    %44 = arith.maximumf %40, %43 : vector<8x1xf32>
    %45 = arith.subf %40, %44 : vector<8x1xf32>
    %46 = math.exp %45 : vector<8x1xf32>
    %47 = vector.broadcast %44 : vector<8x1xf32> to vector<8x8xf32>
    %48 = arith.subf %39, %47 : vector<8x8xf32>
    %49 = math.exp %48 : vector<8x8xf32>
    %50 = arith.mulf %46, %41 : vector<8x1xf32>
    %cst_18 = arith.constant dense<0.000000e+00> : vector<8xf32>
    %51 = vector.multi_reduction <add>, %49, %cst_18 [1] : vector<8x8xf32> to vector<8xf32>
    %52 = vector.shape_cast %51 : vector<8xf32> to vector<8x1xf32>
    %53 = arith.addf %50, %52 : vector<8x1xf32>
    %cst_19 = arith.constant dense<0.000000e+00> : vector<8x8xf32>
    %54 = tpu.matmul %49, %38, %cst_19 {dimension_numbers = #tpu.dot_dimension_numbers<[1], [0], [0], [1], [0, 0, 1, 1], [], []>} : vector<8x8xf32>, vector<8x8xf32>, vector<8x8xf32> -> vector<8x8xf32>
    %55 = vector.shape_cast %44 : vector<8x1xf32> to vector<8x1xf32>
    %56 = vector.broadcast %55 : vector<8x1xf32> to vector<8x8xf32>
    %57 = vector.shape_cast %53 : vector<8x1xf32> to vector<8x1xf32>
    %58 = vector.broadcast %57 : vector<8x1xf32> to vector<8x8xf32>
    %59 = vector.shape_cast %46 : vector<8x1xf32> to vector<8x1xf32>
    %60 = vector.broadcast %59 : vector<8x1xf32> to vector<8x8xf32>
    %61 = vector.extract_strided_slice %4 {offsets = [0, 16], sizes = [8, 8], strides = [1, 1]} : vector<8x128xf32> to vector<8x8xf32>
    %62 = vector.extract_strided_slice %6 {offsets = [0, 16], sizes = [8, 8], strides = [1, 1]} : vector<8x128xf32> to vector<8x8xf32>
    %63 = vector.extract_strided_slice %8 {offsets = [0, 16], sizes = [8, 8], strides = [1, 1]} : vector<8x128xf32> to vector<8x8xf32>
    %cst_20 = arith.constant dense<0.000000e+00> : vector<8x8xf32>
    %64 = tpu.matmul %61, %62, %cst_20 {dimension_numbers = #tpu.dot_dimension_numbers<[1], [1], [0], [0], [0, 0, 1, 0], [], []>} : vector<8x8xf32>, vector<8x8xf32>, vector<8x8xf32> -> vector<8x8xf32>
    %65 = vector.extract_strided_slice %9 {offsets = [0, 16], sizes = [8, 1], strides = [1, 1]} : vector<8x128xf32> to vector<8x1xf32>
    %66 = vector.extract_strided_slice %10 {offsets = [0, 16], sizes = [8, 1], strides = [1, 1]} : vector<8x128xf32> to vector<8x1xf32>
    %cst_21 = arith.constant dense<0xFF800000> : vector<8xf32>
    %67 = vector.multi_reduction <maximumf>, %64, %cst_21 [1] : vector<8x8xf32> to vector<8xf32>
    %68 = vector.shape_cast %67 : vector<8xf32> to vector<8x1xf32>
    %69 = arith.maximumf %65, %68 : vector<8x1xf32>
    %70 = arith.subf %65, %69 : vector<8x1xf32>
    %71 = math.exp %70 : vector<8x1xf32>
    %72 = vector.broadcast %69 : vector<8x1xf32> to vector<8x8xf32>
    %73 = arith.subf %64, %72 : vector<8x8xf32>
    %74 = math.exp %73 : vector<8x8xf32>
    %75 = arith.mulf %71, %66 : vector<8x1xf32>
    %cst_22 = arith.constant dense<0.000000e+00> : vector<8xf32>
    %76 = vector.multi_reduction <add>, %74, %cst_22 [1] : vector<8x8xf32> to vector<8xf32>
    %77 = vector.shape_cast %76 : vector<8xf32> to vector<8x1xf32>
    %78 = arith.addf %75, %77 : vector<8x1xf32>
    %cst_23 = arith.constant dense<0.000000e+00> : vector<8x8xf32>
    %79 = tpu.matmul %74, %63, %cst_23 {dimension_numbers = #tpu.dot_dimension_numbers<[1], [0], [0], [1], [0, 0, 1, 1], [], []>} : vector<8x8xf32>, vector<8x8xf32>, vector<8x8xf32> -> vector<8x8xf32>
    %80 = vector.shape_cast %69 : vector<8x1xf32> to vector<8x1xf32>
    %81 = vector.broadcast %80 : vector<8x1xf32> to vector<8x8xf32>
    %82 = vector.shape_cast %78 : vector<8x1xf32> to vector<8x1xf32>
    %83 = vector.broadcast %82 : vector<8x1xf32> to vector<8x8xf32>
    %84 = vector.shape_cast %71 : vector<8x1xf32> to vector<8x1xf32>
    %85 = vector.broadcast %84 : vector<8x1xf32> to vector<8x8xf32>
    %86 = vector.extract_strided_slice %4 {offsets = [0, 24], sizes = [8, 8], strides = [1, 1]} : vector<8x128xf32> to vector<8x8xf32>
    %87 = vector.extract_strided_slice %6 {offsets = [0, 24], sizes = [8, 8], strides = [1, 1]} : vector<8x128xf32> to vector<8x8xf32>
    %88 = vector.extract_strided_slice %8 {offsets = [0, 24], sizes = [8, 8], strides = [1, 1]} : vector<8x128xf32> to vector<8x8xf32>
    %cst_24 = arith.constant dense<0.000000e+00> : vector<8x8xf32>
    %89 = tpu.matmul %86, %87, %cst_24 {dimension_numbers = #tpu.dot_dimension_numbers<[1], [1], [0], [0], [0, 0, 1, 0], [], []>} : vector<8x8xf32>, vector<8x8xf32>, vector<8x8xf32> -> vector<8x8xf32>
    %90 = vector.extract_strided_slice %9 {offsets = [0, 24], sizes = [8, 1], strides = [1, 1]} : vector<8x128xf32> to vector<8x1xf32>
    %91 = vector.extract_strided_slice %10 {offsets = [0, 24], sizes = [8, 1], strides = [1, 1]} : vector<8x128xf32> to vector<8x1xf32>
    %cst_25 = arith.constant dense<0xFF800000> : vector<8xf32>
    %92 = vector.multi_reduction <maximumf>, %89, %cst_25 [1] : vector<8x8xf32> to vector<8xf32>
    %93 = vector.shape_cast %92 : vector<8xf32> to vector<8x1xf32>
    %94 = arith.maximumf %90, %93 : vector<8x1xf32>
    %95 = arith.subf %90, %94 : vector<8x1xf32>
    %96 = math.exp %95 : vector<8x1xf32>
    %97 = vector.broadcast %94 : vector<8x1xf32> to vector<8x8xf32>
    %98 = arith.subf %89, %97 : vector<8x8xf32>
    %99 = math.exp %98 : vector<8x8xf32>
    %100 = arith.mulf %96, %91 : vector<8x1xf32>
    %cst_26 = arith.constant dense<0.000000e+00> : vector<8xf32>
    %101 = vector.multi_reduction <add>, %99, %cst_26 [1] : vector<8x8xf32> to vector<8xf32>
    %102 = vector.shape_cast %101 : vector<8xf32> to vector<8x1xf32>
    %103 = arith.addf %100, %102 : vector<8x1xf32>
    %cst_27 = arith.constant dense<0.000000e+00> : vector<8x8xf32>
    %104 = tpu.matmul %99, %88, %cst_27 {dimension_numbers = #tpu.dot_dimension_numbers<[1], [0], [0], [1], [0, 0, 1, 1], [], []>} : vector<8x8xf32>, vector<8x8xf32>, vector<8x8xf32> -> vector<8x8xf32>
    %105 = vector.shape_cast %94 : vector<8x1xf32> to vector<8x1xf32>
    %106 = vector.broadcast %105 : vector<8x1xf32> to vector<8x8xf32>
    %107 = vector.shape_cast %103 : vector<8x1xf32> to vector<8x1xf32>
    %108 = vector.broadcast %107 : vector<8x1xf32> to vector<8x8xf32>
    %109 = vector.shape_cast %96 : vector<8x1xf32> to vector<8x1xf32>
    %110 = vector.broadcast %109 : vector<8x1xf32> to vector<8x8xf32>
    %cst_28 = arith.constant 0.000000e+00 : f32
    %111 = vector.broadcast %cst_28 : f32 to vector<8x96xf32>
    %cst_29 = arith.constant 1.000000e+00 : f32
    %112 = vector.broadcast %cst_29 : f32 to vector<8x96xf32>
    %113 = tpu.concatenate %31, %56, %81, %106, %111 in 1 : vector<8x8xf32>, vector<8x8xf32>, vector<8x8xf32>, vector<8x8xf32>, vector<8x96xf32> -> vector<8x128xf32>
    %c0_30 = arith.constant 0 : index
    %c0_31 = arith.constant 0 : index
    %114 = vector.load %arg7[%c0_30, %c0_31] : memref<8x128xf32, #tpu.memory_space<vmem>>, vector<8x128xf32>
    tpu.vector_store %arg7[%c0_30, %c0_31], %113 {strides = array<i32>} : memref<8x128xf32, #tpu.memory_space<vmem>>, vector<8x128xf32>,
    %115 = tpu.concatenate %33, %58, %83, %108, %112 in 1 : vector<8x8xf32>, vector<8x8xf32>, vector<8x8xf32>, vector<8x8xf32>, vector<8x96xf32> -> vector<8x128xf32>
    %c0_32 = arith.constant 0 : index
    %c0_33 = arith.constant 0 : index
    %116 = vector.load %arg8[%c0_32, %c0_33] : memref<8x128xf32, #tpu.memory_space<vmem>>, vector<8x128xf32>
    tpu.vector_store %arg8[%c0_32, %c0_33], %115 {strides = array<i32>} : memref<8x128xf32, #tpu.memory_space<vmem>>, vector<8x128xf32>,
    %c0_34 = arith.constant 0 : index
    %c0_35 = arith.constant 0 : index
    %117 = vector.load %arg9[%c0_34, %c0_35] : memref<8x128xf32, #tpu.memory_space<vmem>>, vector<8x128xf32>
    %118 = tpu.concatenate %35, %60, %85, %110, %112 in 1 : vector<8x8xf32>, vector<8x8xf32>, vector<8x8xf32>, vector<8x8xf32>, vector<8x96xf32> -> vector<8x128xf32>
    %119 = arith.mulf %117, %118 : vector<8x128xf32>
    %120 = tpu.concatenate %29, %54, %79, %104, %111 in 1 : vector<8x8xf32>, vector<8x8xf32>, vector<8x8xf32>, vector<8x8xf32>, vector<8x96xf32> -> vector<8x128xf32>
    %121 = arith.addf %119, %120 : vector<8x128xf32>
    %c0_36 = arith.constant 0 : index
    %c0_37 = arith.constant 0 : index
    %122 = vector.load %arg9[%c0_36, %c0_37] : memref<8x128xf32, #tpu.memory_space<vmem>>, vector<8x128xf32>
    tpu.vector_store %arg9[%c0_36, %c0_37], %121 {strides = array<i32>} : memref<8x128xf32, #tpu.memory_space<vmem>>, vector<8x128xf32>,
    %c0_i32_38 = arith.constant 0 : i32
    %123 = arith.cmpi eq, %arg2, %c0_i32_38 : i32
    %124 = arith.extui %123 : i1 to i32
    %c0_i32_39 = arith.constant 0 : i32
    %125 = arith.cmpi ne, %124, %c0_i32_39 : i32
    scf.if %125 {
      %c0_40 = arith.constant 0 : index
      %c0_41 = arith.constant 0 : index
      %126 = vector.load %arg8[%c0_40, %c0_41] : memref<8x128xf32, #tpu.memory_space<vmem>>, vector<8x128xf32>
      %127 = tpu.reciprocal %126 : vector<8x128xf32> -> vector<8x128xf32>
      %c0_42 = arith.constant 0 : index
      %c0_43 = arith.constant 0 : index
      %128 = vector.load %arg9[%c0_42, %c0_43] : memref<8x128xf32, #tpu.memory_space<vmem>>, vector<8x128xf32>
      %129 = arith.mulf %128, %127 : vector<8x128xf32>
      %c0_44 = arith.constant 0 : index
      %c0_45 = arith.constant 0 : index
      %c0_46 = arith.constant 0 : index
      %130 = vector.load %arg6[%c0_44, %c0_45, %c0_46] : memref<1x8x128xf32, #tpu.memory_space<vmem>>, vector<1x8x128xf32>
      %131 = vector.shape_cast %130 : vector<1x8x128xf32> to vector<8x128xf32>
      %132 = vector.shape_cast %129 : vector<8x128xf32> to vector<1x8x128xf32>
      tpu.vector_store %arg6[%c0_44, %c0_45, %c0_46], %132 {strides = array<i32>} : memref<1x8x128xf32, #tpu.memory_space<vmem>>, vector<1x8x128xf32>,
    } else {
    }
    return
  }
  func.func @transform_0(%arg0: i32, %arg1: i32, %arg2: i32) -> (i32, i32, i32) {
    %c0_i32 = arith.constant 0 : i32
    %c0_i32_0 = arith.constant 0 : i32
    return %arg0, %arg1, %c0_i32 : i32, i32, i32
  }
  func.func @transform_1(%arg0: i32, %arg1: i32, %arg2: i32) -> (i32, i32, i32) {
    %c1_i32 = arith.constant 1 : i32
    %c0_i32 = arith.constant 0 : i32
    return %arg0, %arg2, %c1_i32 : i32, i32, i32
  }
  func.func @transform_2(%arg0: i32, %arg1: i32, %arg2: i32) -> (i32, i32, i32) {
    %c2_i32 = arith.constant 2 : i32
    %c0_i32 = arith.constant 0 : i32
    return %arg0, %arg2, %c2_i32 : i32, i32, i32
  }
  func.func @transform_3(%arg0: i32, %arg1: i32, %arg2: i32) -> (i32, i32, i32) {
    %c0_i32 = arith.constant 0 : i32
    %c0_i32_0 = arith.constant 0 : i32
    return %arg0, %arg1, %c0_i32 : i32, i32, i32
  }
}

module attributes {stable_mosaic.version = 11 : i64} {
  func.func @_linear_bias_kernel(%arg0: i32, %arg1: i32, %arg2: i32, %arg3: memref<16x128xf32, #tpu.memory_space<vmem>>, %arg4: memref<128x384xf32, #tpu.memory_space<vmem>>, %arg5: memref<1x384xf32, #tpu.memory_space<vmem>>, %arg6: memref<16x384xf32, #tpu.memory_space<vmem>>, %arg7: memref<16x384xf32, #tpu.memory_space<vmem>>) attributes {dimension_semantics = [#tpu.dimension_semantics<parallel>, #tpu.dimension_semantics<parallel>, #tpu.dimension_semantics<arbitrary>], iteration_bounds = array<i64: 1, 1, 1>, scalar_prefetch = 0 : i64, scratch_operands = 1 : i64, tpu.core_type = #tpu.core_type<tc>, window_params = [{transform_indices = @transform_0, window_bounds = array<i64: 16, 128>}, {transform_indices = @transform_1, window_bounds = array<i64: 128, 384>}, {transform_indices = @transform_2, window_bounds = array<i64: 1, 384>}, {transform_indices = @transform_3, window_bounds = array<i64: 16, 384>}]} {
    %c0_i32 = arith.constant 0 : i32
    %0 = arith.cmpi eq, %arg2, %c0_i32 : i32
    %1 = arith.extui %0 : i1 to i32
    %c0_i32_0 = arith.constant 0 : i32
    %2 = arith.cmpi ne, %1, %c0_i32_0 : i32
    scf.if %2 {
      %cst_10 = arith.constant 0.000000e+00 : f32
      %12 = vector.broadcast %cst_10 : f32 to vector<16x384xf32>
      %c0_11 = arith.constant 0 : index
      %c0_12 = arith.constant 0 : index
      %13 = vector.load %arg7[%c0_11, %c0_12] : memref<16x384xf32, #tpu.memory_space<vmem>>, vector<16x384xf32>
      tpu.vector_store %arg7[%c0_11, %c0_12], %12 {strides = array<i32>} : memref<16x384xf32, #tpu.memory_space<vmem>>, vector<16x384xf32>,
    } else {
    }
    %c0 = arith.constant 0 : index
    %c0_1 = arith.constant 0 : index
    %3 = vector.load %arg7[%c0, %c0_1] : memref<16x384xf32, #tpu.memory_space<vmem>>, vector<16x384xf32>
    %c0_2 = arith.constant 0 : index
    %c0_3 = arith.constant 0 : index
    %4 = vector.load %arg3[%c0_2, %c0_3] : memref<16x128xf32, #tpu.memory_space<vmem>>, vector<16x128xf32>
    %c0_4 = arith.constant 0 : index
    %c0_5 = arith.constant 0 : index
    %5 = vector.load %arg4[%c0_4, %c0_5] : memref<128x384xf32, #tpu.memory_space<vmem>>, vector<128x384xf32>
    %cst = arith.constant dense<0.000000e+00> : vector<16x384xf32>
    %6 = tpu.matmul %4, %5, %cst {dimension_numbers = #tpu.dot_dimension_numbers<[1], [0], [0], [1], [0, 0, 1, 1], [], []>} : vector<16x128xf32>, vector<128x384xf32>, vector<16x384xf32> -> vector<16x384xf32>
    %7 = arith.addf %3, %6 : vector<16x384xf32>
    %c0_6 = arith.constant 0 : index
    %c0_7 = arith.constant 0 : index
    %8 = vector.load %arg7[%c0_6, %c0_7] : memref<16x384xf32, #tpu.memory_space<vmem>>, vector<16x384xf32>
    tpu.vector_store %arg7[%c0_6, %c0_7], %7 {strides = array<i32>} : memref<16x384xf32, #tpu.memory_space<vmem>>, vector<16x384xf32>,
    %c0_i32_8 = arith.constant 0 : i32
    %9 = arith.cmpi eq, %arg2, %c0_i32_8 : i32
    %10 = arith.extui %9 : i1 to i32
    %c0_i32_9 = arith.constant 0 : i32
    %11 = arith.cmpi ne, %10, %c0_i32_9 : i32
    scf.if %11 {
      %c0_10 = arith.constant 0 : index
      %c0_11 = arith.constant 0 : index
      %12 = vector.load %arg7[%c0_10, %c0_11] : memref<16x384xf32, #tpu.memory_space<vmem>>, vector<16x384xf32>
      %c0_12 = arith.constant 0 : index
      %c0_13 = arith.constant 0 : index
      %13 = vector.load %arg5[%c0_12, %c0_13] : memref<1x384xf32, #tpu.memory_space<vmem>>, vector<1x384xf32>
      %14 = vector.broadcast %13 : vector<1x384xf32> to vector<16x384xf32>
      %15 = arith.addf %12, %14 : vector<16x384xf32>
      %c0_14 = arith.constant 0 : index
      %c0_15 = arith.constant 0 : index
      %16 = vector.load %arg6[%c0_14, %c0_15] : memref<16x384xf32, #tpu.memory_space<vmem>>, vector<16x384xf32>
      tpu.vector_store %arg6[%c0_14, %c0_15], %15 {strides = array<i32>} : memref<16x384xf32, #tpu.memory_space<vmem>>, vector<16x384xf32>,
    } else {
    }
    return
  }
  func.func @transform_0(%arg0: i32, %arg1: i32, %arg2: i32) -> (i32, i32) {
    %c0_i32 = arith.constant 0 : i32
    return %arg0, %arg2 : i32, i32
  }
  func.func @transform_1(%arg0: i32, %arg1: i32, %arg2: i32) -> (i32, i32) {
    %c0_i32 = arith.constant 0 : i32
    return %arg2, %arg1 : i32, i32
  }
  func.func @transform_2(%arg0: i32, %arg1: i32, %arg2: i32) -> (i32, i32) {
    %c0_i32 = arith.constant 0 : i32
    %c0_i32_0 = arith.constant 0 : i32
    return %c0_i32, %arg1 : i32, i32
  }
  func.func @transform_3(%arg0: i32, %arg1: i32, %arg2: i32) -> (i32, i32) {
    %c0_i32 = arith.constant 0 : i32
    return %arg0, %arg1 : i32, i32
  }
}

module attributes {stable_mosaic.version = 11 : i64} {
  func.func @_linear_bias_kernel(%arg0: i32, %arg1: i32, %arg2: i32, %arg3: memref<16x128xf32, #tpu.memory_space<vmem>>, %arg4: memref<128x128xf32, #tpu.memory_space<vmem>>, %arg5: memref<1x128xf32, #tpu.memory_space<vmem>>, %arg6: memref<16x128xf32, #tpu.memory_space<vmem>>, %arg7: memref<16x128xf32, #tpu.memory_space<vmem>>) attributes {dimension_semantics = [#tpu.dimension_semantics<parallel>, #tpu.dimension_semantics<parallel>, #tpu.dimension_semantics<arbitrary>], iteration_bounds = array<i64: 1, 1, 1>, scalar_prefetch = 0 : i64, scratch_operands = 1 : i64, tpu.core_type = #tpu.core_type<tc>, window_params = [{transform_indices = @transform_0, window_bounds = array<i64: 16, 128>}, {transform_indices = @transform_1, window_bounds = array<i64: 128, 128>}, {transform_indices = @transform_2, window_bounds = array<i64: 1, 128>}, {transform_indices = @transform_3, window_bounds = array<i64: 16, 128>}]} {
    %c0_i32 = arith.constant 0 : i32
    %0 = arith.cmpi eq, %arg2, %c0_i32 : i32
    %1 = arith.extui %0 : i1 to i32
    %c0_i32_0 = arith.constant 0 : i32
    %2 = arith.cmpi ne, %1, %c0_i32_0 : i32
    scf.if %2 {
      %cst_10 = arith.constant 0.000000e+00 : f32
      %12 = vector.broadcast %cst_10 : f32 to vector<16x128xf32>
      %c0_11 = arith.constant 0 : index
      %c0_12 = arith.constant 0 : index
      %13 = vector.load %arg7[%c0_11, %c0_12] : memref<16x128xf32, #tpu.memory_space<vmem>>, vector<16x128xf32>
      tpu.vector_store %arg7[%c0_11, %c0_12], %12 {strides = array<i32>} : memref<16x128xf32, #tpu.memory_space<vmem>>, vector<16x128xf32>,
    } else {
    }
    %c0 = arith.constant 0 : index
    %c0_1 = arith.constant 0 : index
    %3 = vector.load %arg7[%c0, %c0_1] : memref<16x128xf32, #tpu.memory_space<vmem>>, vector<16x128xf32>
    %c0_2 = arith.constant 0 : index
    %c0_3 = arith.constant 0 : index
    %4 = vector.load %arg3[%c0_2, %c0_3] : memref<16x128xf32, #tpu.memory_space<vmem>>, vector<16x128xf32>
    %c0_4 = arith.constant 0 : index
    %c0_5 = arith.constant 0 : index
    %5 = vector.load %arg4[%c0_4, %c0_5] : memref<128x128xf32, #tpu.memory_space<vmem>>, vector<128x128xf32>
    %cst = arith.constant dense<0.000000e+00> : vector<16x128xf32>
    %6 = tpu.matmul %4, %5, %cst {dimension_numbers = #tpu.dot_dimension_numbers<[1], [0], [0], [1], [0, 0, 1, 1], [], []>} : vector<16x128xf32>, vector<128x128xf32>, vector<16x128xf32> -> vector<16x128xf32>
    %7 = arith.addf %3, %6 : vector<16x128xf32>
    %c0_6 = arith.constant 0 : index
    %c0_7 = arith.constant 0 : index
    %8 = vector.load %arg7[%c0_6, %c0_7] : memref<16x128xf32, #tpu.memory_space<vmem>>, vector<16x128xf32>
    tpu.vector_store %arg7[%c0_6, %c0_7], %7 {strides = array<i32>} : memref<16x128xf32, #tpu.memory_space<vmem>>, vector<16x128xf32>,
    %c0_i32_8 = arith.constant 0 : i32
    %9 = arith.cmpi eq, %arg2, %c0_i32_8 : i32
    %10 = arith.extui %9 : i1 to i32
    %c0_i32_9 = arith.constant 0 : i32
    %11 = arith.cmpi ne, %10, %c0_i32_9 : i32
    scf.if %11 {
      %c0_10 = arith.constant 0 : index
      %c0_11 = arith.constant 0 : index
      %12 = vector.load %arg7[%c0_10, %c0_11] : memref<16x128xf32, #tpu.memory_space<vmem>>, vector<16x128xf32>
      %c0_12 = arith.constant 0 : index
      %c0_13 = arith.constant 0 : index
      %13 = vector.load %arg5[%c0_12, %c0_13] : memref<1x128xf32, #tpu.memory_space<vmem>>, vector<1x128xf32>
      %14 = vector.broadcast %13 : vector<1x128xf32> to vector<16x128xf32>
      %15 = arith.addf %12, %14 : vector<16x128xf32>
      %c0_14 = arith.constant 0 : index
      %c0_15 = arith.constant 0 : index
      %16 = vector.load %arg6[%c0_14, %c0_15] : memref<16x128xf32, #tpu.memory_space<vmem>>, vector<16x128xf32>
      tpu.vector_store %arg6[%c0_14, %c0_15], %15 {strides = array<i32>} : memref<16x128xf32, #tpu.memory_space<vmem>>, vector<16x128xf32>,
    } else {
    }
    return
  }
  func.func @transform_0(%arg0: i32, %arg1: i32, %arg2: i32) -> (i32, i32) {
    %c0_i32 = arith.constant 0 : i32
    return %arg0, %arg2 : i32, i32
  }
  func.func @transform_1(%arg0: i32, %arg1: i32, %arg2: i32) -> (i32, i32) {
    %c0_i32 = arith.constant 0 : i32
    return %arg2, %arg1 : i32, i32
  }
  func.func @transform_2(%arg0: i32, %arg1: i32, %arg2: i32) -> (i32, i32) {
    %c0_i32 = arith.constant 0 : i32
    %c0_i32_0 = arith.constant 0 : i32
    return %c0_i32, %arg1 : i32, i32
  }
  func.func @transform_3(%arg0: i32, %arg1: i32, %arg2: i32) -> (i32, i32) {
    %c0_i32 = arith.constant 0 : i32
    return %arg0, %arg1 : i32, i32
  }
}

</mosaic_0001>

<bundles_post_ra>
// kernel: self_attention_forward.3
= control target key start
LH: loop header
LB: loop body
LE: loop exit
PB: predicated region body
PF: predicated region fallthrough
CT: control target
= control target key end

     0   :  { %s401_s1 = inlined_call_operand.vmem [shape: f32[128,384], index: 1, kind: input, shape index: {}]   ;;  %s402_s0 = inlined_call_operand.vmem [shape: f32[16,128], index: 0, kind: input, shape index: {}]   ;;  %s403_s2 = inlined_call_operand.vmem [shape: f32[1,384], index: 2, kind: input, shape index: {}]   ;;  %s404_s3 = inlined_call_operand.vmem [shape: f32[16,384], index: 3, kind: output, shape index: {}]  }
   0x1   :  { %v79_v0 = vld [vmem:[%s401_s1 + $0x178] sm:$0xff]  ;;  %v76_v1 = vld [vmem:[%s401_s1 + $0x160] sm:$0xff]  ;;  %v78_v2 = vld [vmem:[%s401_s1 + $0x170] sm:$0xff] }
   0x2   :  { %126 = vmatpush.msra.mxu2 %v79_v0  ;;  %v77_v3 = vld [vmem:[%s401_s1 + $0x168] sm:$0xff]  ;;  %103 = vmatpush.msra.mxu1 %v78_v2  ;;  %v75_v5 = vld [vmem:[%s401_s1 + $0x158] sm:$0xff]  ;;  %v74_v6 = vld [vmem:[%s401_s1 + $0x150] sm:$0xff] }
   0x3   :  { %v73_v4 = vld [vmem:[%s401_s1 + $0x148] sm:$0xff]  ;;  %194 = vmatpush.msra.mxu3 %v77_v3  ;;  %v72_v7 = vld [vmem:[%s401_s1 + $0x140] sm:$0xff]  ;;  %v71_v8 = vld [vmem:[%s401_s1 + $0x138] sm:$0xff]  ;;  %80 = vmatpush.msra.mxu0 %v77_v3 }
   0x4   :  { %127 = vmatpush.msra.mxu2 %v76_v1  ;;  %v70_v9 = vld [vmem:[%s401_s1 + $0x130] sm:$0xff]  ;;  %104 = vmatpush.msra.mxu1 %v75_v5  ;;  %v69_v10 = vld [vmem:[%s401_s1 + $0x128] sm:$0xff]  ;;  %v68_v11 = vld [vmem:[%s401_s1 + $0x120] sm:$0xff] }
   0x5   :  { %195 = vmatpush.msra.mxu3 %v74_v6  ;;  %81 = vmatpush.msra.mxu0 %v74_v6  ;;  %v67_v12 = vld [vmem:[%s401_s1 + $0x118] sm:$0xff]  ;;  %v66_v13 = vld [vmem:[%s401_s1 + $0x110] sm:$0xff]  ;;  %v65_v14 = vld [vmem:[%s401_s1 + $0x108] sm:$0xff] }
   0x6   :  { %128 = vmatpush.msra.mxu2 %v73_v4  ;;  %105 = vmatpush.msra.mxu1 %v72_v7  ;;  %v64_v15 = vld [vmem:[%s401_s1 + $0x100] sm:$0xff]  ;;  %v63_v16 = vld [vmem:[%s401_s1 + $0xf8] sm:$0xff]  ;;  %v62_v17 = vld [vmem:[%s401_s1 + $0xf0] sm:$0xff] }
   0x7   :  { %196 = vmatpush.msra.mxu3 %v71_v8  ;;  %82 = vmatpush.msra.mxu0 %v71_v8  ;;  %v61_v18 = vld [vmem:[%s401_s1 + $0xe8] sm:$0xff]  ;;  %v60_v19 = vld [vmem:[%s401_s1 + $0xe0] sm:$0xff]  ;;  %v59_v20 = vld [vmem:[%s401_s1 + $0xd8] sm:$0xff] }
   0x8   :  { %129 = vmatpush.msra.mxu2 %v70_v9  ;;  %106 = vmatpush.msra.mxu1 %v69_v10  ;;  %v58_v21 = vld [vmem:[%s401_s1 + $0xd0] sm:$0xff]  ;;  %v57_v22 = vld [vmem:[%s401_s1 + $0xc8] sm:$0xff]  ;;  %v56_v23 = vld [vmem:[%s401_s1 + $0xc0] sm:$0xff] }
   0x9   :  { %197 = vmatpush.msra.mxu3 %v68_v11  ;;  %83 = vmatpush.msra.mxu0 %v68_v11  ;;  %v55_v24 = vld [vmem:[%s401_s1 + $0xb8] sm:$0xff]  ;;  %v54_v25 = vld [vmem:[%s401_s1 + $0xb0] sm:$0xff]  ;;  %v53_v26 = vld [vmem:[%s401_s1 + $0xa8] sm:$0xff] }
   0xa   :  { %130 = vmatpush.msra.mxu2 %v67_v12  ;;  %107 = vmatpush.msra.mxu1 %v66_v13  ;;  %v52_v27 = vld [vmem:[%s401_s1 + $0xa0] sm:$0xff]  ;;  %v51_v28 = vld [vmem:[%s401_s1 + $0x98] sm:$0xff]  ;;  %v50_v29 = vld [vmem:[%s401_s1 + $0x90] sm:$0xff] }
   0xb   :  { %198 = vmatpush.msra.mxu3 %v65_v14  ;;  %84 = vmatpush.msra.mxu0 %v65_v14  ;;  %v49_v30 = vld [vmem:[%s401_s1 + $0x88] sm:$0xff]  ;;  %v48_v31 = vld [vmem:[%s401_s1 + $0x80] sm:$0xff]  ;;  %v47_v32 = vld [vmem:[%s401_s1 + $0x78] sm:$0xff] }
   0xc   :  { %131 = vmatpush.msra.mxu2 %v64_v15  ;;  %108 = vmatpush.msra.mxu1 %v63_v16  ;;  %v46_v33 = vld [vmem:[%s401_s1 + $0x70] sm:$0xff]  ;;  %v45_v34 = vld [vmem:[%s401_s1 + $0x68] sm:$0xff]  ;;  %v44_v35 = vld [vmem:[%s401_s1 + $0x60] sm:$0xff] }
   0xd   :  { %199 = vmatpush.msra.mxu3 %v62_v17  ;;  %85 = vmatpush.msra.mxu0 %v62_v17  ;;  %v43_v36 = vld [vmem:[%s401_s1 + $0x58] sm:$0xff]  ;;  %v42_v37 = vld [vmem:[%s401_s1 + $0x50] sm:$0xff]  ;;  %v41_v38 = vld [vmem:[%s401_s1 + $0x48] sm:$0xff] }
   0xe   :  { %132 = vmatpush.msra.mxu2 %v61_v18  ;;  %109 = vmatpush.msra.mxu1 %v60_v19  ;;  %v40_v39 = vld [vmem:[%s401_s1 + $0x40] sm:$0xff]  ;;  %v39_v40 = vld [vmem:[%s401_s1 + $0x38] sm:$0xff]  ;;  %v38_v41 = vld [vmem:[%s401_s1 + $0x30] sm:$0xff] }
   0xf   :  { %200 = vmatpush.msra.mxu3 %v59_v20  ;;  %86 = vmatpush.msra.mxu0 %v59_v20  ;;  %v37_v42 = vld [vmem:[%s401_s1 + $0x28] sm:$0xff]  ;;  %v36_v43 = vld [vmem:[%s401_s1 + $0x20] sm:$0xff]  ;;  %v35_v44 = vld [vmem:[%s401_s1 + $0x18] sm:$0xff] }
  0x10   :  { %133 = vmatpush.msra.mxu2 %v58_v21  ;;  %110 = vmatpush.msra.mxu1 %v57_v22  ;;  %v34_v45 = vld [vmem:[%s401_s1 + $0x10] sm:$0xff]  ;;  %v30_v46 = vld [vmem:[%s402_s0] sm:$0xff]  ;;  %v33_v47 = vld [vmem:[%s401_s1 + $0x8] sm:$0xff] }
  0x11   :  { %201 = vmatpush.msra.mxu3 %v56_v23  ;;  %87 = vmatpush.msra.mxu0 %v56_v23  ;;  %v32_v48 = vld [vmem:[%s401_s1] sm:$0xff]  ;;  %v31_v49 = vld [vmem:[%s402_s0 + $0x8] sm:$0xff] }
  0x12   :  { %134 = vmatpush.msra.mxu2 %v55_v24  ;;  %111 = vmatpush.msra.mxu1 %v54_v25  ;;  %v170_v50 = vld [vmem:[%s403_s2] sm:$0x7] }
  0x13   :  { %202 = vmatpush.msra.mxu3 %v53_v26  ;;  %88 = vmatpush.msra.mxu0 %v53_v26  ;;  %v173_v51 = vperm.slane %v170_v50, 1  ;;  %v172_v52 = vperm.slane %v170_v50, 0  ;;  %v174_v55 = vperm.slane %v170_v50, 2 }
  0x14   :  { %135 = vmatpush.msra.mxu2 %v52_v27  ;;  %112 = vmatpush.msra.mxu1 %v51_v28 }
  0x15   :  { %203 = vmatpush.msra.mxu3 %v50_v29  ;;  %89 = vmatpush.msra.mxu0 %v50_v29 }
  0x16   :  { %136 = vmatpush.msra.mxu2 %v49_v30  ;;  %113 = vmatpush.msra.mxu1 %v48_v31 }
  0x17   :  { %204 = vmatpush.msra.mxu3 %v47_v32  ;;  %90 = vmatpush.msra.mxu0 %v47_v32 }
  0x18   :  { %137 = vmatpush.msra.mxu2 %v46_v33  ;;  %114 = vmatpush.msra.mxu1 %v45_v34 }
  0x19   :  { %205 = vmatpush.msra.mxu3 %v44_v35  ;;  %91 = vmatpush.msra.mxu0 %v44_v35 }
  0x1a   :  { %138 = vmatpush.msra.mxu2 %v43_v36  ;;  %115 = vmatpush.msra.mxu1 %v42_v37 }
  0x1b   :  { %206 = vmatpush.msra.mxu3 %v41_v38  ;;  %92 = vmatpush.msra.mxu0 %v41_v38 }
  0x1c   :  { %139 = vmatpush.msra.mxu2 %v40_v39  ;;  %116 = vmatpush.msra.mxu1 %v39_v40 }
  0x1d   :  { %207 = vmatpush.msra.mxu3 %v38_v41  ;;  %93 = vmatpush.msra.mxu0 %v38_v41 }
  0x1e   :  { %140 = vmatpush.msra.mxu2 %v37_v42  ;;  %117 = vmatpush.msra.mxu1 %v36_v43 }
  0x1f   :  { %208 = vmatpush.msra.mxu3 %v35_v44  ;;  %94 = vmatpush.msra.mxu0 %v35_v44 }
  0x20   :  { %141 = vmatpush.msra.mxu2 %v34_v45  ;;  %118 = vmatpush.msra.mxu1 %v33_v47 }
  0x21   :  { %142 = vmatmul.f32.vlgmr.msra.gmra.mxu2 %v30_v46  ;;  %119 = vmatmul.f32.vlgmr.msra.gmra.mxu1 %v30_v46 }
  0x22   :  { %209 = vmatpush.msra.mxu3 %v32_v48  ;;  %95 = vmatpush.msra.mxu0 %v32_v48 }
  0x23   :  { %99 = vmatmul.f32.vlgmr.msra.gmra.mxu3 %v31_v49  ;;  %96 = vmatmul.f32.vlgmr.msra.gmra.mxu0 %v30_v46 }
  0x29   :  { %145 = vmatmul.f32.gmra.mxu2 %v31_v49  ;;  %122 = vmatmul.f32.gmra.mxu1 %v31_v49 }
  0x9e   :  { %v120_v53 = vpop.f32.mrf.mxu1 }
  0x9f   :  { %v179_v54 = vadd.f32 %v173_v51, %v120_v53 }
  0xa0   :  { %v97_v56 = vpop.f32.mrf.mxu0 }
  0xa1   :  { %185 = vst [vmem:[%s404_s3 + $0x8] sm:$0xff] %v179_v54  ;;  %v178_v57 = vadd.f32 %v172_v52, %v97_v56 }
  0xa3   :  { %184 = vst [vmem:[%s404_s3] sm:$0xff] %v178_v57 }
  0xa4   :  { %v143_v58 = vpop.f32.mrf.mxu2 }
  0xa5   :  { %v180_v59 = vadd.f32 %v174_v55, %v143_v58 }
  0xa6   :  { %v100_v60 = vpop.f32.mrf.mxu3  ;;  %v123_v62 = vpop.f32.mrf.mxu1 }
  0xa7   :  { %186 = vst [vmem:[%s404_s3 + $0x10] sm:$0xff] %v180_v59  ;;  %v181_v61 = vadd.f32 %v172_v52, %v100_v60  ;;  %v182_v63 = vadd.f32 %v173_v51, %v123_v62 }
  0xa9   :  { %187 = vst [vmem:[%s404_s3 + $0x18] sm:$0xff] %v181_v61 }
  0xaa   :  { %188 = vst [vmem:[%s404_s3 + $0x20] sm:$0xff] %v182_v63 }
  0xac   :  { %v146_v0 = vpop.f32.mrf.mxu2 }
  0xad   :  { %v183_v1 = vadd.f32 %v174_v55, %v146_v0 }
  0xaf   :  { %189 = vst [vmem:[%s404_s3 + $0x28] sm:$0xff] %v183_v1 }

// kernel: self_attention_forward.4
= control target key start
LH: loop header
LB: loop body
LE: loop exit
PB: predicated region body
PF: predicated region fallthrough
CT: control target
= control target key end

     0   :  { %s960_s12 = smov 0   ;;  %s962_s13 = smov 0   ;;  %s1060_s0 = inlined_call_operand.vmem [shape: f32[2,8,384], index: 0, kind: input, shape index: {}, may-alias: {0,1,2}]   ;;  %s1061_s1 = inlined_call_operand.vmem [shape: f32[2,8,384], index: 1, kind: input, shape index: {}, may-alias: {0,1,2}]   ;;  %s1062_s2 = inlined_call_operand.vmem [shape: f32[2,8,384], index: 2, kind: input, shape index: {}, may-alias: {0,1,2}]   ;;  %s1063_s3 = inlined_call_operand.vmem [shape: f32[2,8,128], index: 3, kind: output, shape index: {}]  }
   0x1   :  { %s964_s14 = smov 0  }
   0x2 LB: > { %s32_s15 = sadd.s32 1, %s924_s13  ;;  %p822_p0 = scmp.ge.s32.totalorder %s928_s14, 1  ;;  %s928_s14 = sphi %s964_s14, %s13_s14   ;;  %s924_s13 = sphi %s962_s13, %s1065_s13   ;;  %s920_s12 = sphi %s960_s12, %s1064_s12  }
   0x3   : > { %p34_p1 = scmp.ge.s32.totalorder %s32_s15, 2  ;;  %p198_p2 = scmp.lt.s32.totalorder %s928_s14, 3 }
   0x5   : > { %s1067_s15 = smov (%p34_p1, %s32_s15), 0  ;;  %p199_p3 = pnand %p822_p0, %p198_p2 }
   0x6   : > { %p248_p4 = scmp.lt.s32.totalorder (!%p199_p3), %s920_s12, 1  ;;  %s930_s23 = smov (!%p199_p3), 120  }
   0x7   : > { %202 = sbr.rel (%p199_p3) target bundleno = 1272 (0x4f8), region = 32  ;;  %s931_s24 = smov (!%p199_p3), 112  }
   0x8   : > { %s932_s25 = smov (!%p199_p3), 104   ;;  %s937_s29 = smov (!%p199_p3), 24  }
   0x9   : > { %s938_s30 = smov (!%p199_p3), 16   ;;  %s939_s4 = smov (!%p199_p3), 8  }
   0xc   : > { %s1069_s12 = smov (!%p248_p4, %s920_s12), 1  ;;  %vm296_vm0 = vcmask 64512   ;;  %v933_v3 = vmov 0   ;;  %v934_v19 = vmov 8   ;;  %v935_v32 = vmov 24  }
   0xd   : > { %s981_s16 = smul.u32 24, %s1069_s12  ;;  %878 = vset.pattern.permute.xlu0 %v933_v3  ;;  %879 = vset.pattern.permute.xlu2 %v934_v19  ;;  %v936_v36 = vmov 16   ;;  %vm630_vm1 = vcmask 130048   ;;  %vm632_vm2 = vcmask 195584   ;;  %vm634_vm3 = vcmask 261120   ;;  %s826_s5 = sshll.u32 %s1069_s12, 3 }
   0xe   : > { %880 = vset.pattern.permute.xlu1 %v936_v36  ;;  %s283_s8 = scalar_lea.vmem %s1063_s3, %s826_s5 }
   0xf   : > { %s758_s19 = scalar_lea.vmem %s1061_s1, %s981_s16  ;;  %s256_s22 = scalar_lea.vmem %s1060_s0, %s981_s16 }
  0x10   : > { %v827_v0 = vld [vmem:[%s758_s19 + $0x8] sm:$0xff]  ;;  %v291_v1 = vld [vmem:[%s256_s22] sm:$0xff]  ;;  %s764_s28 = scalar_lea.vmem %s1062_s2, %s981_s16 }
  0x11   : > { %378 = vrot.lane.b32.xlu1 %v827_v0, %s930_s23  ;;  %829 = vmatpush.xpose.msk.msra.mxu0 %vm296_vm0, %v827_v0  ;;  %v828_v13 = vld [vmem:[%s764_s28 + $0x10] sm:$0xff] }
  0x12   : > { %463 = vrot.lane.b32.xlu2 %v827_v0, %s931_s24  ;;  %361 = vmatpush.msra.mxu1 %v828_v13 }
  0x14   : > { %830 = vmatmul.msk.f32.vlgmr.msra.gmra.mxu0 %vm296_vm0, %v291_v1 }
  0x19   : > { %376 = vrot.lane.b32.xlu1 %v291_v1, %s930_s23 }
  0x1a   : > { %547 = vrot.lane.b32.xlu2 %v827_v0, %s932_s25 }
  0x21   : > { %461 = vrot.lane.b32.xlu1 %v291_v1, %s931_s24 }
  0x22   : > { %545 = vrot.lane.b32.xlu2 %v291_v1, %s932_s25 }
  0x6c   : > { %v464_v2 = vpop.permute.xlu2 %463 }
  0x6d   : > { %835 = vmatpush.xpose.msk.msrb.mxu1 %vm296_vm0, %v464_v2 }
  0x74   : > { %v548_v4 = vpop.permute.xlu2 %547 }
  0x75   : > { %838 = vmatpush.xpose.msk.msrb.mxu0 %vm296_vm0, %v548_v4 }
  0x7c   : > { %v546_v6 = vpop.permute.xlu2 %545 }
  0x7d   : > { %839 = vmatmul.msk.f32.vlgmr.msrb.gmra.mxu0 %vm296_vm0, %v546_v6 }
  0x83   : > { %v379_v5 = vpop.permute.xlu1 %378 }
  0x84   : > { %832 = vmatpush.xpose.msk.msra.mxu2 %vm296_vm0, %v379_v5 }
  0x8b   : > { %v377_v7 = vpop.permute.xlu1 %376 }
  0x8c   : > { %833 = vmatmul.msk.f32.vlgmr.msra.gmra.mxu2 %vm296_vm0, %v377_v7 }
  0x91   : > { %v320_v8 = vpop.f32.mrf.mxu0 }
  0x92   : > { %v323_v9 = vsel %vm296_vm0, %v320_v8, -inf }
  0x93   : > { %324 = vmax.xlane.f32.xlu0 %v323_v9  ;;  %v462_v22 = vpop.permute.xlu1 %461 }
  0xfa   : > { %v570_v14 = vpop.f32.mrf.mxu0 }
  0xfb   : > { %v573_v15 = vsel %vm296_vm0, %v570_v14, -inf }
 0x106   : > { %v325_v10 = vpop.xlane.xlu0 %324 }
 0x107   : > { %332 = vperm.xlu0 %878, %v325_v10   ;;  %v327_v16 = vsub.f32 -inf, %v325_v10 }
 0x109   : > { %v328_v17 = vmul.f32 1.442695, %v327_v16 }
 0x10b   : > { %888 = vpow2.f32 %v328_v17 }
 0x10f   : > { %v401_v11 = vpop.f32.mrf.mxu2 }
 0x110   : > { %v404_v12 = vsel %vm296_vm0, %v401_v11, -inf }
 0x111   : > { %405 = vmax.xlane.f32.xlu1 %v404_v12  ;;  %v889_v18 = vpop.eup %888 }
 0x112   : > { %v338_v50 = vmul.f32 0.0, %v889_v18 }
 0x131   : > { %574 = vmax.xlane.f32.xlu0 %v573_v15 }
 0x145   : > { %425 = vrot.lane.b32.xlu0 %v828_v13, %s930_s23 }
 0x14d   : > { %373 = vperm.xlu0 %878, %v889_v18  }
 0x155   : > { %883 = vset.pattern.permute.xlu0 %v934_v19 }
 0x179   : > { %v333_v20 = vpop.permute.xlu0 %332 }
 0x17a   : > { %v335_v21 = vsub.f32 %v320_v8, %v333_v20 }
 0x17c   : > { %v336_v23 = vmul.f32 1.442695, %v335_v21 }
 0x17e   : > { %890 = vpow2.f32 %v336_v23 }
 0x184   : > { %v891_v24 = vpop.eup %890  ;;  %v1012_v25 = vpop.xlane.xlu1 %405 }
 0x185   : > { %413 = vperm.xlu2 %879, %v1012_v25   ;;  %831 = vmatmul.msk.f32.vlgmr.msra.gmra.mxu1 %vm296_vm0, %v891_v24  ;;  %v339_v43 = vsel %vm296_vm0, %v891_v24, 0.0  ;;  %v408_v0 = vsub.f32 -inf, %v1012_v25 }
 0x187   : > { %v409_v1 = vmul.f32 1.442695, %v408_v0 }
 0x18d   : > { %836 = vmatmul.msk.f32.vlgmr.msrb.gmra.mxu1 %vm296_vm0, %v462_v22  ;;  %881 = vset.pattern.permute.xlu2 %v935_v32 }
 0x1a4   : > { %v575_v26 = vpop.xlane.xlu0 %574 }
 0x1a5   : > { %v577_v56 = vsub.f32 -inf, %v575_v26 }
 0x1a7   : > { %v578_v57 = vmul.f32 1.442695, %v577_v56 }
 0x1b7   : > { %v426_v27 = vpop.permute.xlu0 %425 }
 0x1b8   : > { %446 = vmatpush.msra.mxu3 %v426_v27 }
 0x1bf   : > { %v374_v10 = vpop.permute.xlu0 %373 }
 0x1df   : > { %v414_v28 = vpop.permute.xlu2 %413 }
 0x1e0   : > { %v416_v29 = vsub.f32 %v401_v11, %v414_v28 }
 0x1e2   : > { %v417_v30 = vmul.f32 1.442695, %v416_v29 }
 0x1e4   : > { %892 = vpow2.f32 %v417_v30 }
 0x1ea   : > { %v893_v31 = vpop.eup %892 }
 0x1eb   : > { %834 = vmatmul.msk.f32.vlgmr.msra.gmra.mxu3 %vm296_vm0, %v893_v31  ;;  %v420_v53 = vsel %vm296_vm0, %v893_v31, 0.0 }
 0x202   : > { %v1019_v33 = vpop.f32.mrf.mxu1 }
 0x20a   : > { %v486_v34 = vpop.f32.mrf.mxu1 }
 0x20b   : > { %v489_v35 = vsel %vm296_vm0, %v486_v34, -inf }
 0x20c   : > { %490 = vmax.xlane.f32.xlu2 %v489_v35 }
 0x224   : > { %582 = vperm.xlu2 %881, %v575_v26  }
 0x22c   : > { %593 = vrot.lane.b32.xlu2 %v828_v13, %s932_s25 }
 0x22d   : > { %882 = vset.pattern.permute.xlu2 %v933_v3 }
 0x26e   : > { %v448_v8 = vpop.f32.mrf.mxu3 }
 0x27f   : > { %v491_v37 = vpop.xlane.xlu2 %490 }
 0x280   : > { %498 = vperm.xlu1 %880, %v491_v37   ;;  %v493_v54 = vsub.f32 -inf, %v491_v37 }
 0x282   : > { %v494_v55 = vmul.f32 1.442695, %v493_v54 }
 0x287   : > { %v583_v38 = vpop.permute.xlu2 %582 }
 0x288   : > { %509 = vrot.lane.b32.xlu1 %v828_v13, %s931_s24  ;;  %v585_v39 = vsub.f32 %v570_v14, %v583_v38 }
 0x28a   : > { %v586_v40 = vmul.f32 1.442695, %v585_v39 }
 0x28c   : > { %894 = vpow2.f32 %v586_v40 }
 0x28f   : > { %v594_v41 = vpop.permute.xlu2 %593 }
 0x290   : > { %614 = vmatpush.msrb.mxu2 %v594_v41 }
 0x292   : > { %v895_v42 = vpop.eup %894 }
 0x293   : > { %840 = vmatmul.msk.f32.vlgmr.msrb.gmra.mxu2 %vm296_vm0, %v895_v42  ;;  %v589_v7 = vsel %vm296_vm0, %v895_v42, 0.0 }
 0x2b2   : > { %340 = vadd.xlane.f32.xlu1 %v339_v43 }
 0x2f2   : > { %v499_v44 = vpop.permute.xlu1 %498 }
 0x2f3   : > { %v501_v45 = vsub.f32 %v486_v34, %v499_v44 }
 0x2f5   : > { %v502_v46 = vmul.f32 1.442695, %v501_v45 }
 0x2f7   : > { %896 = vpow2.f32 %v502_v46 }
 0x2f8   : > { %898 = vpow2.f32 %v494_v55 }
 0x2f9   : > { %900 = vpow2.f32 %v578_v57 }
 0x2fa   : > { %v510_v47 = vpop.permute.xlu1 %509  ;;  %902 = vpow2.f32 %v409_v1 }
 0x2fb   : > { %530 = vmatpush.msrb.mxu3 %v510_v47 }
 0x2fd   : > { %v897_v48 = vpop.eup %896 }
 0x2fe   : > { %837 = vmatmul.msk.f32.vlgmr.msrb.gmra.mxu3 %vm296_vm0, %v897_v48  ;;  %v505_v49 = vsel %vm296_vm0, %v897_v48, 0.0  ;;  %v899_v58 = vpop.eup %898 }
 0x2ff   : > { %506 = vadd.xlane.f32.xlu1 %v505_v49  ;;  %v901_v59 = vpop.eup %900  ;;  %v504_v60 = vmul.f32 0.0, %v899_v58 }
 0x300   : > { %v903_v3 = vpop.eup %902  ;;  %v588_v14 = vmul.f32 0.0, %v901_v59 }
 0x301   : > { %v419_v4 = vmul.f32 0.0, %v903_v3 }
 0x316   : > { %v616_v63 = vpop.f32.mrf.mxu2 }
 0x325   : > { %v341_v51 = vpop.xlane.xlu1 %340 }
 0x326   : > { %v342_v52 = vadd.f32 %v341_v51, %v338_v50 }
 0x328   : > { %368 = vperm.xlu2 %882, %v342_v52  }
 0x330   : > { %884 = vset.pattern.permute.xlu2 %v936_v36 }
 0x351   : > { %421 = vadd.xlane.f32.xlu2 %v420_v53 }
 0x369   : > { %542 = vperm.xlu2 %884, %v899_v58  }
 0x371   : > { %886 = vset.pattern.permute.xlu2 %v935_v32 }
 0x372   : > { %v507_v61 = vpop.xlane.xlu1 %506  ;;  %626 = vperm.xlu2 %886, %v901_v59  }
 0x373   : > { %v508_v62 = vadd.f32 %v507_v61, %v504_v60 }
 0x375   : > { %537 = vperm.xlu1 %880, %v508_v62  }
 0x37a   : > { %657 = vrot.lane.b32.xlu2 %v616_v63, %s937_s29 }
 0x37d   : > { %885 = vset.pattern.permute.xlu1 %v935_v32 }
 0x381   : > { %v532_v9 = vpop.f32.mrf.mxu3 }
 0x382   : > { %v369_v2 = vpop.permute.xlu2 %368 }
 0x3c4   : > { %v422_v5 = vpop.xlane.xlu2 %421 }
 0x3c5   : > { %v423_v6 = vadd.f32 %v422_v5, %v419_v4 }
 0x3c7   : > { %453 = vperm.xlu0 %883, %v423_v6  }
 0x3cc   : > { %v543_v17 = vpop.permute.xlu2 %542 }
 0x3cf   : > { %458 = vperm.xlu0 %883, %v903_v3  }
 0x3d4   : > { %v627_v22 = vpop.permute.xlu2 %626 }
 0x3d7   : > { %887 = vset.pattern.permute.xlu0 %v935_v32 }
 0x3dc   : > { %v658_v34 = vpop.permute.xlu2 %657 }
 0x3e7   : > { %v538_v18 = vpop.permute.xlu1 %537 }
 0x3f9   : > { %590 = vadd.xlane.f32.xlu0 %v589_v7 }
 0x40d   : > { %653 = vrot.lane.b32.xlu0 %v532_v9, %s938_s30 }
 0x439   : > { %v454_v11 = vpop.permute.xlu0 %453 }
 0x43a   : > { %v637_v19 = vsel %vm296_vm0, %v369_v2, %v454_v11 }
 0x43b   : > { %v638_v20 = vsel %vm630_vm1, %v637_v19, %v538_v18 }
 0x441   : > { %v459_v12 = vpop.permute.xlu0 %458 }
 0x442   : > { %v643_v13 = vsel %vm296_vm0, %v374_v10, %v459_v12 }
 0x443   : > { %v644_v25 = vsel %vm630_vm1, %v643_v13, %v543_v17 }
 0x444   : > { %v645_v30 = vsel %vm632_vm2, %v644_v25, %v627_v22 }
 0x445   : > { %v646_v37 = vsel %vm634_vm3, %v645_v30, 1.0 }
 0x446   : > { %v647_v42 = vmul.f32 0.0, %v646_v37 }
 0x46c   : > { %v591_v15 = vpop.xlane.xlu0 %590 }
 0x46d   : > { %v592_v16 = vadd.f32 %v591_v15, %v588_v14 }
 0x46f   : > { %621 = vperm.xlu1 %885, %v592_v16  }
 0x477   : > { %649 = vrot.lane.b32.xlu1 %v448_v8, %s939_s4 }
 0x47f   : > { %v654_v28 = vpop.permute.xlu0 %653 }
 0x4e1   : > { %v622_v21 = vpop.permute.xlu1 %621 }
 0x4e2   : > { %v639_v23 = vsel %vm632_vm2, %v638_v20, %v622_v21 }
 0x4e3   : > { %v640_v24 = vsel %vm634_vm3, %v639_v23, 1.0 }
 0x4e4   : > { %904 = vrcp.f32 %v640_v24  ;;  %v681_v38 = vand.u32 2147483648, %v640_v24  ;;  %v679_v40 = vand.u32 2147483647, %v640_v24  ;;  %vm675_vm5 = vweird.f32 %v640_v24 }
 0x4e6   : > { %v682_v43 = vor.u32 1.1754944e-38, %v681_v38  ;;  %vm680_vm7 = vcmp.eq.f32.partialorder %v679_v40, 8.507059e+37 }
 0x4e9   : > { %v650_v26 = vpop.permute.xlu1 %649 }
 0x4ea   : > { %v905_v27 = vpop.eup %904  ;;  %v660_v29 = vsel %vm296_vm0, %v1019_v33, %v650_v26 }
 0x4eb   : > { %v671_v31 = vmul.f32 %v905_v27, %v640_v24  ;;  %v661_v32 = vsel %vm630_vm1, %v660_v29, %v654_v28  ;;  %vm676_vm4 = vweird.f32 %v905_v27 }
 0x4ec   : > { %v662_v36 = vsel %vm632_vm2, %v661_v32, %v658_v34  ;;  %vm677_vm6 = vmor %vm675_vm5, %vm676_vm4 }
 0x4ed   : > { %v672_v35 = vsub.f32 1.0, %v671_v31  ;;  %v663_v41 = vsel %vm634_vm3, %v662_v36, 0.0 }
 0x4ee   : > { %v664_v45 = vadd.f32 %v663_v41, %v647_v42 }
 0x4ef   : > { %v673_v39 = vmul.f32 %v905_v27, %v672_v35 }
 0x4f1   : > { %v674_v33 = vadd.f32 %v905_v27, %v673_v39 }
 0x4f3   : > { %v678_v44 = vsel %vm677_vm6, %v905_v27, %v674_v33 }
 0x4f4   : > { %v683_v46 = vsel %vm680_vm7, %v682_v43, %v678_v44 }
 0x4f5   : > { %v685_v47 = vmul.f32 %v683_v46, %v664_v45 }
 0x4f7   : > { %686 = vst [vmem:[%s283_s8] sm:$0xff] %v685_v47 }
 0x4f8 PF: > { %s13_s14 = sadd.s32 1, %s928_s14   ;;  %s1064_s12 = smov %s924_s13 }
 0x4f9   : > { %p10_p5 = scmp.ge.s32.totalorder %s13_s14, 4   ;;  %s1065_s13 = smov %s1067_s15 }
 0x4fb   :  { %12 = sbr.rel (!%p10_p5) target bundleno = 2 (0x2), region = 76 }

// kernel: self_attention_forward.5
= control target key start
LH: loop header
LB: loop body
LE: loop exit
PB: predicated region body
PF: predicated region fallthrough
CT: control target
= control target key end

     0   :  { %s184_s1 = inlined_call_operand.vmem [shape: f32[128,128], index: 1, kind: input, shape index: {}]   ;;  %s185_s2 = inlined_call_operand.vmem [shape: f32[1,128], index: 2, kind: input, shape index: {}]   ;;  %s186_s0 = inlined_call_operand.vmem [shape: f32[16,128], index: 0, kind: input, shape index: {}]   ;;  %s187_s3 = inlined_call_operand.vmem [shape: f32[16,128], index: 3, kind: output, shape index: {}]  }
   0x1   :  { %v39_v0 = vld [vmem:[%s184_s1 + $0x78] sm:$0xff]  ;;  %v38_v1 = vld [vmem:[%s184_s1 + $0x70] sm:$0xff]  ;;  %v37_v2 = vld [vmem:[%s184_s1 + $0x68] sm:$0xff] }
   0x2   :  { %40 = vmatpush.msra.mxu0 %v39_v0  ;;  %84 = vmatpush.msra.mxu1 %v39_v0  ;;  %v36_v3 = vld [vmem:[%s184_s1 + $0x60] sm:$0xff]  ;;  %v35_v4 = vld [vmem:[%s184_s1 + $0x58] sm:$0xff]  ;;  %v34_v5 = vld [vmem:[%s184_s1 + $0x50] sm:$0xff] }
   0x3   :  { %v33_v6 = vld [vmem:[%s184_s1 + $0x48] sm:$0xff]  ;;  %v32_v7 = vld [vmem:[%s184_s1 + $0x40] sm:$0xff]  ;;  %v31_v8 = vld [vmem:[%s184_s1 + $0x38] sm:$0xff] }
   0x4   :  { %41 = vmatpush.msra.mxu0 %v38_v1  ;;  %85 = vmatpush.msra.mxu1 %v38_v1  ;;  %v30_v9 = vld [vmem:[%s184_s1 + $0x30] sm:$0xff]  ;;  %v29_v10 = vld [vmem:[%s184_s1 + $0x28] sm:$0xff]  ;;  %v28_v11 = vld [vmem:[%s184_s1 + $0x20] sm:$0xff] }
   0x5   :  { %v27_v12 = vld [vmem:[%s184_s1 + $0x18] sm:$0xff]  ;;  %v26_v13 = vld [vmem:[%s184_s1 + $0x10] sm:$0xff]  ;;  %v25_v14 = vld [vmem:[%s184_s1 + $0x8] sm:$0xff] }
   0x6   :  { %42 = vmatpush.msra.mxu0 %v37_v2  ;;  %86 = vmatpush.msra.mxu1 %v37_v2  ;;  %v24_v15 = vld [vmem:[%s184_s1] sm:$0xff]  ;;  %v23_v17 = vld [vmem:[%s186_s0 + $0x8] sm:$0xff] }
   0x7   :  { %v22_v16 = vld [vmem:[%s186_s0] sm:$0xff] }
   0x8   :  { %43 = vmatpush.msra.mxu0 %v36_v3  ;;  %87 = vmatpush.msra.mxu1 %v36_v3  ;;  %v100_v18 = vld [vmem:[%s185_s2] ss:$0 sm:$0xff] }
   0xa   :  { %44 = vmatpush.msra.mxu0 %v35_v4  ;;  %88 = vmatpush.msra.mxu1 %v35_v4 }
   0xc   :  { %45 = vmatpush.msra.mxu0 %v34_v5  ;;  %89 = vmatpush.msra.mxu1 %v34_v5 }
   0xe   :  { %46 = vmatpush.msra.mxu0 %v33_v6  ;;  %90 = vmatpush.msra.mxu1 %v33_v6 }
  0x10   :  { %47 = vmatpush.msra.mxu0 %v32_v7  ;;  %91 = vmatpush.msra.mxu1 %v32_v7 }
  0x12   :  { %48 = vmatpush.msra.mxu0 %v31_v8  ;;  %92 = vmatpush.msra.mxu1 %v31_v8 }
  0x14   :  { %49 = vmatpush.msra.mxu0 %v30_v9  ;;  %93 = vmatpush.msra.mxu1 %v30_v9 }
  0x16   :  { %50 = vmatpush.msra.mxu0 %v29_v10  ;;  %94 = vmatpush.msra.mxu1 %v29_v10 }
  0x18   :  { %51 = vmatpush.msra.mxu0 %v28_v11  ;;  %95 = vmatpush.msra.mxu1 %v28_v11 }
  0x1a   :  { %52 = vmatpush.msra.mxu0 %v27_v12  ;;  %96 = vmatpush.msra.mxu1 %v27_v12 }
  0x1c   :  { %53 = vmatpush.msra.mxu0 %v26_v13  ;;  %97 = vmatpush.msra.mxu1 %v26_v13 }
  0x1e   :  { %54 = vmatpush.msra.mxu0 %v25_v14  ;;  %98 = vmatpush.msra.mxu1 %v25_v14 }
  0x20   :  { %55 = vmatpush.msra.mxu0 %v24_v15  ;;  %99 = vmatpush.msra.mxu1 %v24_v15 }
  0x21   :  { %56 = vmatmul.f32.vlgmr.msra.gmra.mxu0 %v22_v16  ;;  %59 = vmatmul.f32.vlgmr.msra.gmra.mxu1 %v23_v17 }
  0x9e   :  { %v57_v19 = vpop.f32.mrf.mxu0  ;;  %v60_v20 = vpop.f32.mrf.mxu1 }
  0x9f   :  { %v76_v21 = vadd.f32 %v100_v18, %v57_v19  ;;  %v77_v22 = vadd.f32 %v100_v18, %v60_v20 }
  0xa1   :  { %78 = vst [vmem:[%s187_s3] sm:$0xff] %v76_v21 }
  0xa2   :  { %79 = vst [vmem:[%s187_s3 + $0x8] sm:$0xff] %v77_v22 }

</bundles_post_ra>
